<compile_context>
chip_gen: v7x
topology: tpu7x:2x2x1
jax: 0.10.0
libtpu: 0.0.40
codegen_flags: <defaults>
</compile_context>

<pallas_src>
import jax
import jax.numpy as jnp
import numpy as np
from jax.experimental import pallas as pl
from jax.experimental.pallas import tpu as pltpu


def lse_kernel(x_ref, w1_ref, b1_ref, w2_ref, b2_ref, o_ref):
    """One batch tile: x_ref is (Nb, C, HW), C on sublanes, HW lane-dense."""
    nb = x_ref.shape[0]
    x = x_ref[...]                                               # (Nb, C, HW), caller dtype

    # fc1: Conv2d(C, Cs, 1) == batched (Cs, C) @ (C, HW) on the MXU, f32 acc.
    w1 = jnp.broadcast_to(w1_ref[...], (nb,) + w1_ref.shape)     # (Nb, Cs, C)
    h = jnp.einsum('bsc,bcx->bsx', w1, x,
                   preferred_element_type=jnp.float32)           # (Nb, Cs, HW)
    h = jnp.maximum(h + b1_ref[...][None], 0.0)                  # bias + ReLU

    # fc2: Conv2d(Cs, C, 1) == batched (C, Cs) @ (Cs, HW) on the MXU.
    w2 = jnp.broadcast_to(w2_ref[...], (nb,) + w2_ref.shape)     # (Nb, C, Cs)
    s = jnp.einsum('bcs,bsx->bcx', w2, h,
                   preferred_element_type=jnp.float32)           # (Nb, C, HW)
    s = s + b2_ref[...][None]

    # PyTorch Hardsigmoid: relu6(s + 3) / 6 == clip(s/6 + 0.5, 0, 1).
    gate = jnp.clip(s * (1.0 / 6.0) + 0.5, 0.0, 1.0)

    o_ref[...] = (gate * x.astype(jnp.float32)).astype(o_ref.dtype)


def _pick_batch_tile(n, c, hw, itemsize):
    """Images per grid step: big enough to amortize per-step overhead, small
    enough that double-buffered in/out + f32 intermediates stay well under the
    32 MiB vmem limit (also keeps >= 2 parallel steps for v7x's two TCs)."""
    image_bytes = c * hw * itemsize
    nb = max(1, (2 * 1024 * 1024) // image_bytes)     # ~2 MiB of input per block
    if n >= 2:
        nb = min(nb, pl.cdiv(n, 2))                   # keep at least 2 grid steps
    return int(min(nb, n))


@jax.jit
def lse_forward(x_nchw, w1, b1, w2, b2):
    """x: (N, C, H, W); w1: (Cs, C); b1: (Cs,); w2: (C, Cs); b2: (C,)."""
    N, C, H, W = x_nchw.shape
    HW = H * W
    Cs = w1.shape[0]

    x = x_nchw.reshape(N, C, HW)                      # free contiguous reshape
    nb = _pick_batch_tile(N, C, HW, jnp.dtype(x.dtype).itemsize)
    grid = (pl.cdiv(N, nb),)

    out = pl.pallas_call(
        lse_kernel,
        out_shape=jax.ShapeDtypeStruct((N, C, HW), x.dtype),   # keep caller dtype
        grid=grid,
        in_specs=[
            pl.BlockSpec((nb, C, HW), lambda n: (n, 0, 0)),    # batch tile of images
            pl.BlockSpec((Cs, C), lambda n: (0, 0)),           # fc1 weight (resident)
            pl.BlockSpec((Cs, 1), lambda n: (0, 0)),           # fc1 bias
            pl.BlockSpec((C, Cs), lambda n: (0, 0)),           # fc2 weight (resident)
            pl.BlockSpec((C, 1), lambda n: (0, 0)),            # fc2 bias
        ],
        out_specs=pl.BlockSpec((nb, C, HW), lambda n: (n, 0, 0)),
        compiler_params=pltpu.CompilerParams(
            dimension_semantics=("parallel",),        # independent batch tiles
            vmem_limit_bytes=32 * 1024 * 1024),
    )(x, w1, b1.reshape(Cs, 1), w2, b2.reshape(C, 1))

    return out.reshape(N, C, H, W)                    # free contiguous reshape


def _hardsigmoid_ref(x):
    return jnp.clip(x / 6.0 + 0.5, 0.0, 1.0)


def ref_forward(x, w1, b1, w2, b2):
    """Pure-JAX NCHW reference with identical math (1x1 convs as einsums)."""
    s = jnp.einsum('sc,nchw->nshw', w1, x) + b1[None, :, None, None]
    s = jnp.maximum(s, 0.0)
    s = jnp.einsum('cs,nshw->nchw', w2, s) + b2[None, :, None, None]
    return _hardsigmoid_ref(s) * x


if __name__ == "__main__":
    # Module config: LocalSqueezeExcitation(input_channels=8, squeeze_channels=2,
    #                                       kernel_size=3)   (avgpool unused in fwd)
    N, C, H, W = 2, 8, 16, 16
    Cs = 2

    key = jax.random.PRNGKey(0)
    kx, k1, k2, k3, k4 = jax.random.split(key, 5)
    x = jax.random.normal(kx, (N, C, H, W), jnp.float32)

    # fc1: Conv2d(C, Cs, 1) -> weight (Cs, C, 1, 1) squeezed to (Cs, C)
    w1 = jax.random.normal(k1, (Cs, C), jnp.float32) * 0.3
    b1 = jax.random.normal(k2, (Cs,), jnp.float32) * 0.1
    # fc2: Conv2d(Cs, C, 1) -> weight (C, Cs, 1, 1) squeezed to (C, Cs)
    w2 = jax.random.normal(k3, (C, Cs), jnp.float32) * 0.3
    b2 = jax.random.normal(k4, (C,), jnp.float32) * 0.1

    # f32 path: exact check against the pure-JAX reference.
    out = jax.block_until_ready(lse_forward(x, w1, b1, w2, b2))
    ref = ref_forward(x, w1, b1, w2, b2)
    np.testing.assert_allclose(np.asarray(out), np.asarray(ref),
                               rtol=1e-4, atol=1e-4)
    assert out.shape == (N, C, H, W) and out.dtype == jnp.float32

    # bf16 path: I/O dtype is preserved end-to-end (no wrapper upcast).
    xb = x.astype(jnp.bfloat16)
    out_b = jax.block_until_ready(lse_forward(xb, w1, b1, w2, b2))
    assert out_b.dtype == jnp.bfloat16 and out_b.shape == (N, C, H, W)
    ref_b = ref_forward(xb.astype(jnp.float32), w1, b1, w2, b2)
    np.testing.assert_allclose(np.asarray(out_b, dtype=np.float32),
                               np.asarray(ref_b), rtol=5e-2, atol=5e-2)

    print("KERNEL_OK")
</pallas_src>

<mosaic_0001>
module attributes {stable_mosaic.version = 11 : i64} {
  func.func @lse_kernel(%arg0: i32, %arg1: memref<1x8x256xf32, #tpu.memory_space<vmem>>, %arg2: memref<2x8xf32, #tpu.memory_space<vmem>>, %arg3: memref<2x1xf32, #tpu.memory_space<vmem>>, %arg4: memref<8x2xf32, #tpu.memory_space<vmem>>, %arg5: memref<8x1xf32, #tpu.memory_space<vmem>>, %arg6: memref<1x8x256xf32, #tpu.memory_space<vmem>>) attributes {dimension_semantics = [#tpu.dimension_semantics<parallel>], iteration_bounds = array<i64: 2>, scalar_prefetch = 0 : i64, scratch_operands = 0 : i64, tpu.core_type = #tpu.core_type<tc>, window_params = [{transform_indices = @transform_0, window_bounds = array<i64: 1, 8, 256>}, {pipeline_mode = #tpu.pipeline_mode<synchronous>, transform_indices = @transform_1, window_bounds = array<i64: 2, 8>}, {pipeline_mode = #tpu.pipeline_mode<synchronous>, transform_indices = @transform_2, window_bounds = array<i64: 2, 1>}, {pipeline_mode = #tpu.pipeline_mode<synchronous>, transform_indices = @transform_3, window_bounds = array<i64: 8, 2>}, {pipeline_mode = #tpu.pipeline_mode<synchronous>, transform_indices = @transform_4, window_bounds = array<i64: 8, 1>}, {transform_indices = @transform_5, window_bounds = array<i64: 1, 8, 256>}]} {
    %c0 = arith.constant 0 : index
    %c0_0 = arith.constant 0 : index
    %c0_1 = arith.constant 0 : index
    %0 = vector.load %arg1[%c0, %c0_0, %c0_1] : memref<1x8x256xf32, #tpu.memory_space<vmem>>, vector<1x8x256xf32>
    %c0_2 = arith.constant 0 : index
    %c0_3 = arith.constant 0 : index
    %1 = vector.load %arg2[%c0_2, %c0_3] : memref<2x8xf32, #tpu.memory_space<vmem>>, vector<2x8xf32>
    %2 = vector.shape_cast %1 : vector<2x8xf32> to vector<1x2x8xf32>
    "tpu.trace_start"() <{level = 10 : i32, message = "bsc,bcx->bsx"}> : () -> ()
    %cst = arith.constant dense<0.000000e+00> : vector<1x2x256xf32>
    %3 = tpu.matmul %2, %0, %cst {dimension_numbers = #tpu.dot_dimension_numbers<[2], [1], [1], [2], [0, 0, 0, 1, 1, 2], [0], [0]>} : vector<1x2x8xf32>, vector<1x8x256xf32>, vector<1x2x256xf32> -> vector<1x2x256xf32>
    "tpu.trace_stop"() : () -> ()
    %c0_4 = arith.constant 0 : index
    %c0_5 = arith.constant 0 : index
    %4 = vector.load %arg3[%c0_4, %c0_5] : memref<2x1xf32, #tpu.memory_space<vmem>>, vector<2x1xf32>
    %5 = vector.shape_cast %4 : vector<2x1xf32> to vector<1x2x1xf32>
    %6 = vector.broadcast %5 : vector<1x2x1xf32> to vector<1x2x256xf32>
    %7 = arith.addf %3, %6 : vector<1x2x256xf32>
    %cst_6 = arith.constant 0.000000e+00 : f32
    %8 = vector.broadcast %cst_6 : f32 to vector<1x2x256xf32>
    %9 = arith.maximumf %7, %8 : vector<1x2x256xf32>
    %c0_7 = arith.constant 0 : index
    %c0_8 = arith.constant 0 : index
    %10 = vector.load %arg4[%c0_7, %c0_8] : memref<8x2xf32, #tpu.memory_space<vmem>>, vector<8x2xf32>
    %11 = vector.shape_cast %10 : vector<8x2xf32> to vector<1x8x2xf32>
    "tpu.trace_start"() <{level = 10 : i32, message = "bcs,bsx->bcx"}> : () -> ()
    %cst_9 = arith.constant dense<0.000000e+00> : vector<1x8x256xf32>
    %12 = tpu.matmul %11, %9, %cst_9 {dimension_numbers = #tpu.dot_dimension_numbers<[2], [1], [1], [2], [0, 0, 0, 1, 1, 2], [0], [0]>} : vector<1x8x2xf32>, vector<1x2x256xf32>, vector<1x8x256xf32> -> vector<1x8x256xf32>
    "tpu.trace_stop"() : () -> ()
    %c0_10 = arith.constant 0 : index
    %c0_11 = arith.constant 0 : index
    %13 = vector.load %arg5[%c0_10, %c0_11] : memref<8x1xf32, #tpu.memory_space<vmem>>, vector<8x1xf32>
    %14 = vector.shape_cast %13 : vector<8x1xf32> to vector<1x8x1xf32>
    %15 = vector.broadcast %14 : vector<1x8x1xf32> to vector<1x8x256xf32>
    %16 = arith.addf %12, %15 : vector<1x8x256xf32>
    %cst_12 = arith.constant 0.166666672 : f32
    %17 = vector.broadcast %cst_12 : f32 to vector<1x8x256xf32>
    %18 = arith.mulf %16, %17 : vector<1x8x256xf32>
    %cst_13 = arith.constant 5.000000e-01 : f32
    %19 = vector.broadcast %cst_13 : f32 to vector<1x8x256xf32>
    %20 = arith.addf %18, %19 : vector<1x8x256xf32>
    %cst_14 = arith.constant 0.000000e+00 : f32
    %cst_15 = arith.constant 1.000000e+00 : f32
    %21 = vector.broadcast %cst_14 : f32 to vector<1x8x256xf32>
    %22 = arith.maximumf %21, %20 : vector<1x8x256xf32>
    %23 = vector.broadcast %cst_15 : f32 to vector<1x8x256xf32>
    %24 = arith.minimumf %23, %22 : vector<1x8x256xf32>
    %25 = arith.mulf %24, %0 : vector<1x8x256xf32>
    %c0_16 = arith.constant 0 : index
    %c0_17 = arith.constant 0 : index
    %c0_18 = arith.constant 0 : index
    %26 = vector.load %arg6[%c0_16, %c0_17, %c0_18] : memref<1x8x256xf32, #tpu.memory_space<vmem>>, vector<1x8x256xf32>
    tpu.vector_store %arg6[%c0_16, %c0_17, %c0_18], %25 {strides = array<i32>} : memref<1x8x256xf32, #tpu.memory_space<vmem>>, vector<1x8x256xf32>,
    return
  }
  func.func @transform_0(%arg0: i32) -> (i32, i32, i32) {
    %c0_i32 = arith.constant 0 : i32
    %c0_i32_0 = arith.constant 0 : i32
    %c0_i32_1 = arith.constant 0 : i32
    return %arg0, %c0_i32, %c0_i32_0 : i32, i32, i32
  }
  func.func @transform_1(%arg0: i32) -> (i32, i32) {
    %c0_i32 = arith.constant 0 : i32
    %c0_i32_0 = arith.constant 0 : i32
    %c0_i32_1 = arith.constant 0 : i32
    return %c0_i32, %c0_i32_0 : i32, i32
  }
  func.func @transform_2(%arg0: i32) -> (i32, i32) {
    %c0_i32 = arith.constant 0 : i32
    %c0_i32_0 = arith.constant 0 : i32
    %c0_i32_1 = arith.constant 0 : i32
    return %c0_i32, %c0_i32_0 : i32, i32
  }
  func.func @transform_3(%arg0: i32) -> (i32, i32) {
    %c0_i32 = arith.constant 0 : i32
    %c0_i32_0 = arith.constant 0 : i32
    %c0_i32_1 = arith.constant 0 : i32
    return %c0_i32, %c0_i32_0 : i32, i32
  }
  func.func @transform_4(%arg0: i32) -> (i32, i32) {
    %c0_i32 = arith.constant 0 : i32
    %c0_i32_0 = arith.constant 0 : i32
    %c0_i32_1 = arith.constant 0 : i32
    return %c0_i32, %c0_i32_0 : i32, i32
  }
  func.func @transform_5(%arg0: i32) -> (i32, i32, i32) {
    %c0_i32 = arith.constant 0 : i32
    %c0_i32_0 = arith.constant 0 : i32
    %c0_i32_1 = arith.constant 0 : i32
    return %arg0, %c0_i32, %c0_i32_0 : i32, i32, i32
  }
}

</mosaic_0001>

<bundles_post_ra>
// kernel: lse_forward.1
= control target key start
LH: loop header
LB: loop body
LE: loop exit
PB: predicated region body
PF: predicated region fallthrough
CT: control target
= control target key end

     0   :  { %s535_s18 = smov 0   ;;  %s571_s0 = inlined_call_operand.vmem [shape: f32[2,8,256], index: 0, kind: input, shape index: {}]   ;;  %s572_s1 = inlined_call_operand.vmem [shape: f32[2,8], index: 1, kind: input, shape index: {}]   ;;  %s573_s2 = inlined_call_operand.vmem [shape: f32[2,1], index: 2, kind: input, shape index: {}]   ;;  %s574_s3 = inlined_call_operand.vmem [shape: f32[8,2], index: 3, kind: input, shape index: {}]   ;;  %s575_s4 = inlined_call_operand.vmem [shape: f32[8,1], index: 4, kind: input, shape index: {}]   ;;  %s576_s5 = inlined_call_operand.vmem [shape: f32[2,8,256], index: 5, kind: output, shape index: {}]  }
   0x1 LB: > { %s467_s19 = sadd.s32 4294967295, %s501_s18   ;;  %p471_p0 = scmp.ge.s32.totalorder %s501_s18, 1  ;;  %s501_s18 = sphi %s535_s18, %s15_s18  }
   0x2   : > { %p187_p1 = scmp.lt.s32.totalorder %s501_s18, 3 }
   0x4   : > { %p188_p2 = pnand %p471_p0, %p187_p1 }
   0x5   : > { %p215_p3 = scmp.lt.s32.totalorder (!%p188_p2), %s467_s19, 1  ;;  %v503_v0 = vmov (!%p188_p2), 0.0   ;;  %v504_v1 = vmov (!%p188_p2), 0   ;;  %v228_v2 = vld [vmem:[%s573_s2] sm:$0x3] (!%p188_p2)  ;;  %vm234_vm0 = vcmask (!%p188_p2), 64512  }
   0x6   : > { %191 = sbr.rel (%p188_p2) target bundleno = 464 (0x1d0), region = 40  ;;  %302 = vmatprep.mubr.f32.mxu0 (!%p188_p2), %v503_v0  ;;  %494 = vset.pattern.permute.xlu0 (!%p188_p2), %v504_v1  ;;  %v312_v3 = vld [vmem:[%s575_s4] sm:$0xff] (!%p188_p2)  ;;  %vm322_vm1 = vcmask (!%p188_p2), 1041408   ;;  %vm318_vm2 = vcmask (!%p188_p2), 15360  }
   0x7   : > { %231 = vperm.xlu0 (!%p188_p2), %494, %v228_v2   ;;  %393 = vmatprep.mubr.f32.mxu1 (!%p188_p2), %v503_v0  ;;  %v227_v6 = vld [vmem:[%s572_s1] sm:$0x3] (!%p188_p2) }
   0x8   : > { %v311_v14 = vld [vmem:[%s574_s3] sm:$0xff] (!%p188_p2) }
   0xb   : > { %315 = vperm.xlu0 (!%p188_p2), %494, %v312_v3  }
   0xd   : > { %s578_s19 = smov (!%p215_p3, %s467_s19), 1 }
   0xe   : > { %s482_s24 = sshll.u32 %s578_s19, 4 }
   0xf   : > { %s219_s27 = scalar_lea.vmem %s571_s0, %s482_s24  ;;  %s224_s9 = scalar_lea.vmem %s576_s5, %s482_s24 }
  0x10   : > { %v226_v4 = vld [vmem:[%s219_s27 + $0x8] sm:$0xff]  ;;  %v225_v5 = vld [vmem:[%s219_s27] sm:$0xff] }
  0x11   : > { %238 = vmatprep.subr.mxu0 %v226_v4 }
  0x12   : > { %239 = vmatpush1.msra.mxu0 %v225_v5 }
  0x13   : > { %476 = vmatmul.mubr.msk.f32.vlgmr.msra.gmra.mrb[0].mxu0 %vm234_vm0, %v227_v6 }
  0x86   : > { %v232_v7 = vpop.permute.xlu0 %231 }
  0x8a   : > { %v316_v15 = vpop.permute.xlu0 %315 }
  0xe6   : > { %v304_v8 = vpop.f32.mrb[0].mxu0 }
  0xe7   : > { %v305_v9 = vadd.f32 %v304_v8, %v232_v7  ;;  %v306_v10 = vpop.f32.mrb[1].mxu0 }
  0xe8   : > { %v307_v11 = vadd.f32 %v306_v10, %v232_v7 }
  0xe9   : > { %v309_v13 = vmax.f32 %v305_v9, 0.0 }
  0xea   : > { %v310_v12 = vmax.f32 %v307_v11, 0.0 }
  0xec   : > { %477 = vmatprep.subr.msk.mxu1 %vm322_vm1, %v310_v12 }
  0xed   : > { %478 = vmatpush1.msk.msra.mxu1 %vm322_vm1, %v309_v13 }
  0xee   : > { %479 = vmatmul.mubr.msk.f32.vlgmr.msra.gmra.mrb[0].mxu1 %vm318_vm2, %v311_v14 }
 0x1c1   : > { %v395_v16 = vpop.f32.mrb[0].mxu1 }
 0x1c2   : > { %v396_v17 = vadd.f32 %v395_v16, %v316_v15  ;;  %v397_v18 = vpop.f32.mrb[1].mxu1 }
 0x1c3   : > { %v398_v19 = vadd.f32 %v397_v18, %v316_v15 }
 0x1c4   : > { %v400_v20 = vmul.f32 0.16666667, %v396_v17 }
 0x1c5   : > { %v401_v21 = vmul.f32 0.16666667, %v398_v19 }
 0x1c6   : > { %v402_v22 = vadd.f32 0.5, %v400_v20 }
 0x1c7   : > { %v403_v23 = vadd.f32 0.5, %v401_v21 }
 0x1c8   : > { %v404_v24 = vmax.f32 %v402_v22, 0.0 }
 0x1c9   : > { %v405_v25 = vmax.f32 %v403_v23, 0.0 }
 0x1ca   : > { %v406_v26 = vmin.f32 %v404_v24, 1.0 }
 0x1cb   : > { %v407_v27 = vmin.f32 %v405_v25, 1.0 }
 0x1cc   : > { %v408_v28 = vmul.f32 %v406_v26, %v225_v5 }
 0x1cd   : > { %v409_v29 = vmul.f32 %v407_v27, %v226_v4 }
 0x1ce   : > { %410 = vst [vmem:[%s224_s9] sm:$0xff] %v408_v28 }
 0x1cf   : > { %411 = vst [vmem:[%s224_s9 + $0x8] sm:$0xff] %v409_v29 }
 0x1d0 PF: > { %s15_s18 = sadd.s32 1, %s501_s18  }
 0x1d1   : > { %p12_p4 = scmp.ge.s32.totalorder %s15_s18, 4  }
 0x1d3   :  { %14 = sbr.rel (!%p12_p4) target bundleno = 1 (0x1), region = 70 }

</bundles_post_ra>
